<compile_context>
chip_gen: v7x
topology: tpu7x:2x2x1
jax: 0.10.0
libtpu: 0.0.40
codegen_flags: <defaults>
</compile_context>

<pallas_src>
import functools

import jax
import jax.numpy as jnp
from jax.experimental import pallas as pl
from jax.experimental.pallas import tpu as pltpu


def tfblock_kernel(x_ref, we_ref, be_ref, wd_ref, bd_ref, o_ref, acc_ref, *, inv_s):
    # x_ref  : (TB, C_in, S_tile)   native-layout activation tile
    # we_ref : (C_in, C_inter)      encoder weight, pre-transposed
    # be_ref : (1, C_inter)         encoder bias
    # wd_ref : (C_inter, C_in)      decoder weight, pre-transposed
    # bd_ref : (1, C_in)            decoder bias
    # o_ref  : (TB, C_in)           output block (resident across S axis)
    # acc_ref: (TB, C_in) f32       pooled-sum accumulator (VMEM scratch)
    s = pl.program_id(1)

    @pl.when(s == 0)
    def _init():
        acc_ref[...] = jnp.zeros_like(acc_ref)

    # Partial spatial sum for this S tile (upcast to f32 for the accumulator;
    # no-op for f32 inputs, keeps bf16 inputs off the slow VPU path on v5e).
    x = x_ref[...].astype(jnp.float32)             # (TB, C_in, S_tile)
    acc_ref[...] += jnp.sum(x, axis=-1)            # (TB, C_in)

    @pl.when(s == pl.num_programs(1) - 1)
    def _finalize():
        pooled = acc_ref[...] * inv_s                                   # (TB, C_in)
        z = jnp.dot(pooled, we_ref[...],
                    preferred_element_type=jnp.float32) + be_ref[...]   # (TB, C_inter)
        out = jnp.dot(z, wd_ref[...],
                      preferred_element_type=jnp.float32) + bd_ref[...] # (TB, C_in)
        o_ref[...] = out.astype(o_ref.dtype)


def _choose_tb(B):
    """Batch-tile size: full B for small batches (valid block = full dim),
    else a multiple of 8 dividing B while keeping >=2 grid steps (megacore)."""
    if B <= 8:
        return B
    for tb in (32, 24, 16, 8):
        if B % tb == 0 and B // tb >= 2:
            return tb
    return B


def _choose_s_tile(S, C_in, TB, itemsize, x_budget_bytes):
    """Largest S tile (multiple of 128 dividing S, or full S) whose
    double-buffered x block fits the VMEM budget."""
    per_elem = 2 * TB * C_in * itemsize            # double-buffered bytes per S element
    max_s = max(x_budget_bytes // per_elem, 1)
    if S <= max_s:
        return S
    t = (max_s // 128) * 128
    while t >= 128:
        if S % t == 0:
            return t
        t -= 128
    return S                                        # fallback: single (large) tile


def tfblock_v2_forward(x_nchw, w_enc, b_enc, w_dec, b_dec):
    """x_nchw: [B, C_in, H, W].  Returns [B, C_in, 1, 1] (matches PyTorch)."""
    B, C_in, H, W = x_nchw.shape
    C_inter = w_enc.shape[0]
    S = H * W

    # Native layout, pure metadata reshape — no transpose, no extra HBM traffic.
    x = x_nchw.reshape(B, C_in, S)

    # Pre-transpose the tiny weights once in the wrapper (no in-kernel XLU .T).
    we_t = jnp.transpose(w_enc)          # (C_in, C_inter)
    wd_t = jnp.transpose(w_dec)          # (C_inter, C_in)
    be = b_enc.reshape(1, C_inter)
    bd = b_dec.reshape(1, C_in)

    # Generation-aware VMEM sizing (v7x has 64 MiB/TC vs 128 MiB on v5e/v6e).
    try:
        vmem_cap = int(pltpu.get_tpu_info().vmem_capacity_bytes)
    except Exception:
        vmem_cap = 64 * 1024 * 1024
    vmem_limit = int(min(vmem_cap * 3 // 4, 100 * 1024 * 1024))
    x_budget = vmem_limit * 2 // 3       # double-buffered x tiles get ~2/3 of the limit

    TB = _choose_tb(B)
    S_tile = _choose_s_tile(S, C_in, TB, jnp.dtype(x.dtype).itemsize, x_budget)
    grid = (B // TB, pl.cdiv(S, S_tile))

    kernel = functools.partial(tfblock_kernel, inv_s=1.0 / float(S))

    out = pl.pallas_call(
        kernel,
        out_shape=jax.ShapeDtypeStruct((B, C_in), x.dtype),
        grid_spec=pltpu.PrefetchScalarGridSpec(
            num_scalar_prefetch=0,
            grid=grid,
            in_specs=[
                pl.BlockSpec((TB, C_in, S_tile), lambda b, s: (b, 0, s)),
                pl.BlockSpec((C_in, C_inter), lambda b, s: (0, 0)),
                pl.BlockSpec((1, C_inter), lambda b, s: (0, 0)),
                pl.BlockSpec((C_inter, C_in), lambda b, s: (0, 0)),
                pl.BlockSpec((1, C_in), lambda b, s: (0, 0)),
            ],
            out_specs=pl.BlockSpec((TB, C_in), lambda b, s: (b, 0)),
            scratch_shapes=[pltpu.VMEM((TB, C_in), jnp.float32)],
        ),
        compiler_params=pltpu.CompilerParams(
            dimension_semantics=("parallel", "arbitrary"),
            vmem_limit_bytes=vmem_limit,
        ),
    )(x, we_t, be, wd_t, bd)

    # [B, C_in] -> [B, C_in, 1, 1]
    return out.reshape(B, C_in, 1, 1)


def _reference(x_nchw, w_enc, b_enc, w_dec, b_dec):
    """Pure-JAX reference mirroring the PyTorch forward (encoder -> pool -> decoder)."""
    B, C_in, H, W = x_nchw.shape
    x = jnp.transpose(x_nchw, (0, 2, 3, 1))                      # [B,H,W,C_in]
    z = jnp.einsum('bhwc,oc->bhwo', x, w_enc) + b_enc            # encoder 1x1
    p = jnp.mean(z, axis=(1, 2))                                 # [B, C_inter]
    o = jnp.einsum('bi,oi->bo', p, w_dec) + b_dec                # decoder 1x1
    return o.reshape(B, C_in, 1, 1)


if __name__ == "__main__":
    # Small shapes consistent with the module (1x1 convs + global pool).
    B, C_in, C_inter, H, W = 2, 32, 16, 16, 16

    key = jax.random.PRNGKey(0)
    kx, k1, k2, k3, k4 = jax.random.split(key, 5)

    x = jax.random.normal(kx, (B, C_in, H, W), dtype=jnp.float32)

    # Deterministic parameter init (uniform, like PyTorch conv default scale).
    fan_enc = C_in
    fan_dec = C_inter
    w_enc = jax.random.uniform(k1, (C_inter, C_in), jnp.float32,
                               -1.0 / fan_enc ** 0.5, 1.0 / fan_enc ** 0.5)
    b_enc = jax.random.uniform(k2, (C_inter,), jnp.float32,
                               -1.0 / fan_enc ** 0.5, 1.0 / fan_enc ** 0.5)
    w_dec = jax.random.uniform(k3, (C_in, C_inter), jnp.float32,
                               -1.0 / fan_dec ** 0.5, 1.0 / fan_dec ** 0.5)
    b_dec = jax.random.uniform(k4, (C_in,), jnp.float32,
                               -1.0 / fan_dec ** 0.5, 1.0 / fan_dec ** 0.5)

    out = tfblock_v2_forward(x, w_enc, b_enc, w_dec, b_dec)
    out = jax.block_until_ready(out)

    ref = _reference(x, w_enc, b_enc, w_dec, b_dec)
    assert out.shape == (B, C_in, 1, 1), out.shape
    assert jnp.allclose(out, ref, atol=1e-4, rtol=1e-4), "mismatch vs reference"

    print("KERNEL_OK")
</pallas_src>

<mosaic_0001>
module attributes {stable_mosaic.version = 11 : i64} {
  func.func @tfblock_kernel(%arg0: i32, %arg1: i32, %arg2: memref<2x32x256xf32, #tpu.memory_space<vmem>>, %arg3: memref<32x16xf32, #tpu.memory_space<vmem>>, %arg4: memref<1x16xf32, #tpu.memory_space<vmem>>, %arg5: memref<16x32xf32, #tpu.memory_space<vmem>>, %arg6: memref<1x32xf32, #tpu.memory_space<vmem>>, %arg7: memref<2x32xf32, #tpu.memory_space<vmem>>, %arg8: memref<2x32xf32, #tpu.memory_space<vmem>>) attributes {dimension_semantics = [#tpu.dimension_semantics<parallel>, #tpu.dimension_semantics<arbitrary>], iteration_bounds = array<i64: 1, 1>, scalar_prefetch = 0 : i64, scratch_operands = 1 : i64, tpu.core_type = #tpu.core_type<tc>, window_params = [{transform_indices = @transform_0, window_bounds = array<i64: 2, 32, 256>}, {pipeline_mode = #tpu.pipeline_mode<synchronous>, transform_indices = @transform_1, window_bounds = array<i64: 32, 16>}, {pipeline_mode = #tpu.pipeline_mode<synchronous>, transform_indices = @transform_2, window_bounds = array<i64: 1, 16>}, {pipeline_mode = #tpu.pipeline_mode<synchronous>, transform_indices = @transform_3, window_bounds = array<i64: 16, 32>}, {pipeline_mode = #tpu.pipeline_mode<synchronous>, transform_indices = @transform_4, window_bounds = array<i64: 1, 32>}, {transform_indices = @transform_5, window_bounds = array<i64: 2, 32>}]} {
    %c0_i32 = arith.constant 0 : i32
    %0 = arith.cmpi eq, %arg1, %c0_i32 : i32
    %1 = arith.extui %0 : i1 to i32
    %c0_i32_0 = arith.constant 0 : i32
    %2 = arith.cmpi ne, %1, %c0_i32_0 : i32
    scf.if %2 {
      %cst_9 = arith.constant 0.000000e+00 : f32
      %11 = vector.broadcast %cst_9 : f32 to vector<2x32xf32>
      %c0_10 = arith.constant 0 : index
      %c0_11 = arith.constant 0 : index
      %12 = vector.load %arg8[%c0_10, %c0_11] : memref<2x32xf32, #tpu.memory_space<vmem>>, vector<2x32xf32>
      tpu.vector_store %arg8[%c0_10, %c0_11], %11 {strides = array<i32>} : memref<2x32xf32, #tpu.memory_space<vmem>>, vector<2x32xf32>,
    } else {
    }
    %c0 = arith.constant 0 : index
    %c0_1 = arith.constant 0 : index
    %c0_2 = arith.constant 0 : index
    %3 = vector.load %arg2[%c0, %c0_1, %c0_2] : memref<2x32x256xf32, #tpu.memory_space<vmem>>, vector<2x32x256xf32>
    %c0_3 = arith.constant 0 : index
    %c0_4 = arith.constant 0 : index
    %4 = vector.load %arg8[%c0_3, %c0_4] : memref<2x32xf32, #tpu.memory_space<vmem>>, vector<2x32xf32>
    %cst = arith.constant dense<0.000000e+00> : vector<2x32xf32>
    %5 = vector.multi_reduction <add>, %3, %cst [2] : vector<2x32x256xf32> to vector<2x32xf32>
    %6 = arith.addf %4, %5 : vector<2x32xf32>
    %c0_5 = arith.constant 0 : index
    %c0_6 = arith.constant 0 : index
    %7 = vector.load %arg8[%c0_5, %c0_6] : memref<2x32xf32, #tpu.memory_space<vmem>>, vector<2x32xf32>
    tpu.vector_store %arg8[%c0_5, %c0_6], %6 {strides = array<i32>} : memref<2x32xf32, #tpu.memory_space<vmem>>, vector<2x32xf32>,
    %c0_i32_7 = arith.constant 0 : i32
    %8 = arith.cmpi eq, %arg1, %c0_i32_7 : i32
    %9 = arith.extui %8 : i1 to i32
    %c0_i32_8 = arith.constant 0 : i32
    %10 = arith.cmpi ne, %9, %c0_i32_8 : i32
    scf.if %10 {
      %c0_9 = arith.constant 0 : index
      %c0_10 = arith.constant 0 : index
      %11 = vector.load %arg8[%c0_9, %c0_10] : memref<2x32xf32, #tpu.memory_space<vmem>>, vector<2x32xf32>
      %cst_11 = arith.constant 3.906250e-03 : f32
      %12 = vector.broadcast %cst_11 : f32 to vector<2x32xf32>
      %13 = arith.mulf %11, %12 : vector<2x32xf32>
      %c0_12 = arith.constant 0 : index
      %c0_13 = arith.constant 0 : index
      %14 = vector.load %arg3[%c0_12, %c0_13] : memref<32x16xf32, #tpu.memory_space<vmem>>, vector<32x16xf32>
      %cst_14 = arith.constant dense<0.000000e+00> : vector<2x16xf32>
      %15 = tpu.matmul %13, %14, %cst_14 {dimension_numbers = #tpu.dot_dimension_numbers<[1], [0], [0], [1], [0, 0, 1, 1], [], []>} : vector<2x32xf32>, vector<32x16xf32>, vector<2x16xf32> -> vector<2x16xf32>
      %c0_15 = arith.constant 0 : index
      %c0_16 = arith.constant 0 : index
      %16 = vector.load %arg4[%c0_15, %c0_16] : memref<1x16xf32, #tpu.memory_space<vmem>>, vector<1x16xf32>
      %17 = vector.broadcast %16 : vector<1x16xf32> to vector<2x16xf32>
      %18 = arith.addf %15, %17 : vector<2x16xf32>
      %c0_17 = arith.constant 0 : index
      %c0_18 = arith.constant 0 : index
      %19 = vector.load %arg5[%c0_17, %c0_18] : memref<16x32xf32, #tpu.memory_space<vmem>>, vector<16x32xf32>
      %cst_19 = arith.constant dense<0.000000e+00> : vector<2x32xf32>
      %20 = tpu.matmul %18, %19, %cst_19 {dimension_numbers = #tpu.dot_dimension_numbers<[1], [0], [0], [1], [0, 0, 1, 1], [], []>} : vector<2x16xf32>, vector<16x32xf32>, vector<2x32xf32> -> vector<2x32xf32>
      %c0_20 = arith.constant 0 : index
      %c0_21 = arith.constant 0 : index
      %21 = vector.load %arg6[%c0_20, %c0_21] : memref<1x32xf32, #tpu.memory_space<vmem>>, vector<1x32xf32>
      %22 = vector.broadcast %21 : vector<1x32xf32> to vector<2x32xf32>
      %23 = arith.addf %20, %22 : vector<2x32xf32>
      %c0_22 = arith.constant 0 : index
      %c0_23 = arith.constant 0 : index
      %24 = vector.load %arg7[%c0_22, %c0_23] : memref<2x32xf32, #tpu.memory_space<vmem>>, vector<2x32xf32>
      tpu.vector_store %arg7[%c0_22, %c0_23], %23 {strides = array<i32>} : memref<2x32xf32, #tpu.memory_space<vmem>>, vector<2x32xf32>,
    } else {
    }
    return
  }
  func.func @transform_0(%arg0: i32, %arg1: i32) -> (i32, i32, i32) {
    %c0_i32 = arith.constant 0 : i32
    %c0_i32_0 = arith.constant 0 : i32
    return %arg0, %c0_i32, %arg1 : i32, i32, i32
  }
  func.func @transform_1(%arg0: i32, %arg1: i32) -> (i32, i32) {
    %c0_i32 = arith.constant 0 : i32
    %c0_i32_0 = arith.constant 0 : i32
    %c0_i32_1 = arith.constant 0 : i32
    return %c0_i32, %c0_i32_0 : i32, i32
  }
  func.func @transform_2(%arg0: i32, %arg1: i32) -> (i32, i32) {
    %c0_i32 = arith.constant 0 : i32
    %c0_i32_0 = arith.constant 0 : i32
    %c0_i32_1 = arith.constant 0 : i32
    return %c0_i32, %c0_i32_0 : i32, i32
  }
  func.func @transform_3(%arg0: i32, %arg1: i32) -> (i32, i32) {
    %c0_i32 = arith.constant 0 : i32
    %c0_i32_0 = arith.constant 0 : i32
    %c0_i32_1 = arith.constant 0 : i32
    return %c0_i32, %c0_i32_0 : i32, i32
  }
  func.func @transform_4(%arg0: i32, %arg1: i32) -> (i32, i32) {
    %c0_i32 = arith.constant 0 : i32
    %c0_i32_0 = arith.constant 0 : i32
    %c0_i32_1 = arith.constant 0 : i32
    return %c0_i32, %c0_i32_0 : i32, i32
  }
  func.func @transform_5(%arg0: i32, %arg1: i32) -> (i32, i32) {
    %c0_i32 = arith.constant 0 : i32
    %c0_i32_0 = arith.constant 0 : i32
    return %arg0, %c0_i32 : i32, i32
  }
}

</mosaic_0001>

<bundles_post_ra>
// kernel: tpu_custom_call.1
= control target key start
LH: loop header
LB: loop body
LE: loop exit
PB: predicated region body
PF: predicated region fallthrough
CT: control target
= control target key end

     0   :  { %10 = vsyncpa [#allocation4], 0  ;;  %s513_s0 = inlined_call_operand.hbm [shape: f32[2,32,256], index: 0, kind: input, shape index: {}]   ;;  %s514_s1 = inlined_call_operand.vmem [shape: f32[32,16], index: 1, kind: input, shape index: {}]   ;;  %s515_s2 = inlined_call_operand.vmem [shape: f32[1,16], index: 2, kind: input, shape index: {}]   ;;  %s516_s3 = inlined_call_operand.vmem [shape: f32[16,32], index: 3, kind: input, shape index: {}]   ;;  %s517_s4 = inlined_call_operand.vmem [shape: f32[1,32], index: 4, kind: input, shape index: {}]   ;;  %s518_s5 = inlined_call_operand.hbm [shape: f32[2,32], index: 5, kind: output, shape index: {}]  }
   0x1   :  { %11 = vsyncpa [#allocation5], 0  ;;  %s425_s18 = smov [#allocation3]   ;;  %s377_s22 = scalar_lea.hbm %s513_s0, 2048 }
   0x2   :  { %s17_s19 = sshll.u32 %s425_s18, 4  ;;  %p378_p0 = scmp.ne.s32.totalorder %s513_s0, %s377_s22  ;;  %s18_s19 = int_to_ptr.vmem [resolvable:$true] %s17_s19 }
   0x3   :  { %p381_p1 = scmp.lt.u32.totalorder %s377_s22, %s513_s0 }
   0x5   :  { %p383_p2 = pnand %p381_p1, %p378_p0 }
   0x7   :  { %386 = shalt.err (!%p383_p2)
}
   0x8   :  { %s387_s27 = scalar_lea.vmem %s18_s19, 2048  ;;  %p392_p4 = scmp.lt.s32.totalorder %s18_s19, %s18_s19 }
   0x9   :  { %p388_p3 = scmp.ne.s32.totalorder %s18_s19, %s387_s27  ;;  %p393_p5 = scmp.lt.s32.totalorder %s387_s27, %s387_s27 }
   0xb   :  { %p394_p6 = por %p393_p5, %p392_p4 }
   0xd   :  { %p395_p7 = pnand %p394_p6, %p388_p3 }
   0xf   :  { %398 = shalt.err (!%p395_p7)
}
  0x10   :  { %s426_s28 = smov 256   ;;  %s427_s29 = smov 16  }
  0x11   :  { %23 = dma.hbm_to_vmem [thread:$0]  %s513_s0, 2048, %s18_s19, [#allocation4], %s426_s28, %s426_s28, %s427_s29  }
  0x12   :  { %421 = dma.done.wait [#allocation4], 2048  }
  0x13   :  { %422 = vsyncadd [#allocation4], 4294965248  ;;  %v49_v0 = vld [vmem:[#allocation3 + $0x40] sm:$0xff]  ;;  %v50_v1 = vld [vmem:[#allocation3 + $0x48] sm:$0xff]  ;;  %vm39_vm0 = vcmask 254976   ;;  %v428_v24 = vmov 0.0   ;;  %v90_v32 = vlaneseq }
  0x14   :  { %v41_v2 = vld [vmem:[#allocation3] sm:$0xff]  ;;  %v70_v3 = vadd.f32 %v50_v1, %v49_v0  ;;  %v42_v4 = vld [vmem:[#allocation3 + $0x8] sm:$0xff]  ;;  %v51_v5 = vld [vmem:[#allocation3 + $0x50] sm:$0xff]  ;;  %40 = vst.msk [vmem:[#allocation2] sm:$0x3] %vm39_vm0, %v428_v24  ;;  %v429_v28 = vmov 0.0|0.0  }
  0x15   :  { %v52_v6 = vld [vmem:[#allocation3 + $0x58] sm:$0xff]  ;;  %v58_v7 = vadd.f32 %v42_v4, %v41_v2  ;;  %v43_v8 = vld [vmem:[#allocation3 + $0x10] sm:$0xff]  ;;  %v53_v12 = vld [vmem:[#allocation3 + $0x60] sm:$0xff]  ;;  %361 = vmatprep.subr.bf16.mxu0 %v429_v28  ;;  %367 = vmatprep.subr.bf16.mxu1 %v429_v28  ;;  %vm430_vm1 = vmmov 0   ;;  %v91_v33 = vand.u32 127, %v90_v32  ;;  %v93_v38 = vshrl.u32 %v90_v32, 7 }
  0x16   :  { %v44_v9 = vld [vmem:[#allocation3 + $0x18] sm:$0xff]  ;;  %71 = vadd.xlane.f32.xlu1 %v70_v3  ;;  %v73_v10 = vadd.f32 %v52_v6, %v51_v5  ;;  %v54_v13 = vld [vmem:[#allocation3 + $0x68] sm:$0xff]  ;;  %v45_v14 = vld [vmem:[#allocation3 + $0x20] sm:$0xff]  ;;  %351 = vmatprep.mubr.msk.f32.mxu0 %vm430_vm1, %v428_v24  ;;  %vm101_vm2 = vcmask 130112   ;;  %vm108_vm3 = vcmask 195712   ;;  %vm115_vm4 = vcmask 261312  }
  0x17   :  { %59 = vadd.xlane.f32.xlu0 %v58_v7  ;;  %v61_v11 = vadd.f32 %v44_v9, %v43_v8  ;;  %v46_v15 = vld [vmem:[#allocation3 + $0x28] sm:$0xff]  ;;  %v76_v16 = vadd.f32 %v54_v13, %v53_v12  ;;  %v55_v18 = vld [vmem:[#allocation3 + $0x70] sm:$0xff]  ;;  %v56_v19 = vld [vmem:[#allocation3 + $0x78] sm:$0xff]  ;;  %358 = vmatprep.mubr.msk.f32.mxu1 %vm430_vm1, %v428_v24  ;;  %v96_v36 = vadd.s32 4294967288, %v91_v33  ;;  %v103_v37 = vadd.s32 4294967280, %v91_v33  ;;  %s431_s21 = smov [#allocation6]  }
  0x18   :  { %v64_v17 = vadd.f32 %v46_v15, %v45_v14  ;;  %v47_v20 = vld [vmem:[#allocation3 + $0x30] sm:$0xff]  ;;  %v48_v21 = vld [vmem:[#allocation3 + $0x38] sm:$0xff]  ;;  %v79_v22 = vadd.f32 %v56_v19, %v55_v18  ;;  %v148_v26 = vld [vmem:[%s514_s1 + $0x8] sm:$0xff]  ;;  %v110_v42 = vadd.s32 4294967272, %v91_v33  ;;  %v94_v44 = vsub.s32 %v91_v33, %v93_v38  ;;  %s322_s22 = sshll.u32 %s431_s21, 4  ;;  %s323_s22 = int_to_ptr.vmem [resolvable:$true] %s322_s22 }
  0x19   :  { %v67_v23 = vadd.f32 %v48_v21, %v47_v20  ;;  %v147_v25 = vld [vmem:[%s514_s1] sm:$0xff]  ;;  %v149_v27 = vld [vmem:[%s514_s1 + $0x10] sm:$0xff]  ;;  %v150_v30 = vld [vmem:[%s514_s1 + $0x18] sm:$0xff]  ;;  %v99_v40 = vsub.s32 %v96_v36, %v93_v38  ;;  %v106_v43 = vsub.s32 %v103_v37, %v93_v38  ;;  %vm136_vm5 = vcmask 1041409   ;;  %p404_p9 = scmp.lt.s32.totalorder %s323_s22, %s323_s22 }
  0x1a   :  { %74 = vadd.xlane.f32.xlu1 %v73_v10  ;;  %v362_v29 = vpack.c.bf16 %v148_v26, %v147_v25  ;;  %v365_v31 = vpack.c.bf16 %v150_v30, %v149_v27  ;;  %v113_v48 = vsub.s32 %v110_v42, %v93_v38  ;;  %vm158_vm6 = vcmask 261120   ;;  %v232_v5 = vld [vmem:[%s516_s3] sm:$0xff]  ;;  %v233_v6 = vld [vmem:[%s516_s3 + $0x8] sm:$0xff]  ;;  %s399_s3 = scalar_lea.vmem %s323_s22, 32 }
  0x1b   :  { %62 = vadd.xlane.f32.xlu0 %v61_v11  ;;  %v57_v63 = vld [vmem:[#allocation2] sm:$0x3]  ;;  %v368_v7 = vpack.c.bf16 %v233_v6, %v232_v5  ;;  %vm241_vm7 = vcmask 130048   ;;  %p400_p8 = scmp.ne.s32.totalorder %s323_s22, %s399_s3  ;;  %p405_p10 = scmp.lt.s32.totalorder %s399_s3, %s399_s3 }
  0x1c   :  { %363 = vmatpush3.bf16.msra.mxu0 %v362_v29  ;;  %v331_v8 = vld [vmem:[%s515_s2] ss:$0 sm:$0xff] }
  0x1d   :  { %364 = vmatprep.subr.bf16.mxu0 %v429_v28  ;;  %369 = vmatpush3.bf16.msra.mxu1 %v368_v7  ;;  %v333_v12 = vld [vmem:[%s517_s4] ss:$0 sm:$0xff]  ;;  %p406_p11 = por %p405_p10, %p404_p9 }
  0x1e   :  { %77 = vadd.xlane.f32.xlu1 %v76_v16 }
  0x1f   :  { %65 = vadd.xlane.f32.xlu0 %v64_v17  ;;  %p407_p12 = pnand %p406_p11, %p400_p8 }
  0x20   :  { %366 = vmatpush3.bf16.msra.mxu0 %v365_v31 }
  0x22   :  { %80 = vadd.xlane.f32.xlu1 %v79_v22 }
  0x23   :  { %68 = vadd.xlane.f32.xlu0 %v67_v23 }
  0xa3   :  { %v72_v34 = vpop.xlane.xlu1 %71 }
  0xa4   :  { %v60_v35 = vpop.xlane.xlu0 %59  ;;  %v120_v51 = vrot.slane %v72_v34, %v94_v44 }
  0xa5   :  { %v95_v53 = vrot.slane %v60_v35, %v94_v44 }
  0xa7   :  { %v75_v39 = vpop.xlane.xlu1 %74 }
  0xa8   :  { %v63_v41 = vpop.xlane.xlu0 %62  ;;  %v124_v46 = vrot.slane %v75_v39, %v99_v40 }
  0xa9   :  { %v100_v49 = vrot.slane %v63_v41, %v99_v40 }
  0xaa   :  { %v125_v55 = vsel %vm101_vm2, %v124_v46, %v120_v51 }
  0xab   :  { %v78_v45 = vpop.xlane.xlu1 %77  ;;  %v102_v58 = vsel %vm101_vm2, %v100_v49, %v95_v53 }
  0xac   :  { %v66_v47 = vpop.xlane.xlu0 %65  ;;  %v129_v50 = vrot.slane %v78_v45, %v106_v43 }
  0xad   :  { %v107_v52 = vrot.slane %v66_v47, %v106_v43 }
  0xae   :  { %v130_v59 = vsel %vm108_vm3, %v129_v50, %v125_v55 }
  0xaf   :  { %v81_v54 = vpop.xlane.xlu1 %80  ;;  %v109_v61 = vsel %vm108_vm3, %v107_v52, %v102_v58 }
  0xb0   :  { %v134_v56 = vrot.slane %v81_v54, %v113_v48  ;;  %v69_v57 = vpop.xlane.xlu0 %68 }
  0xb1   :  { %v114_v60 = vrot.slane %v69_v57, %v113_v48 }
  0xb2   :  { %v135_v62 = vsel %vm115_vm4, %v134_v56, %v130_v59 }
  0xb3   :  { %v116_v0 = vsel %vm115_vm4, %v114_v60, %v109_v61 }
  0xb4   :  { %v137_v1 = vsel %vm136_vm5, %v135_v62, %v116_v0 }
  0xb5   :  { %v139_v2 = vadd.f32 %v137_v1, %v57_v63 }
  0xb7   :  { %141 = vst.msk [vmem:[#allocation2] sm:$0x3] %vm39_vm0, %v139_v2 }
  0xbe   :  { %v145_v3 = vld [vmem:[#allocation2] sm:$0x3] }
  0xbf   :  { %v146_v4 = vmul.f32 0.00390625, %v145_v3 }
  0xc1   :  { %352 = vmatmul.mubr.msk.f32.vlgmr.msra.gmra.mrb[0].mxu0 %vm158_vm6, %v146_v4 }
 0x194   :  { %v228_v9 = vpop.f32.mrb[0].mxu0 }
 0x195   :  { %v229_v10 = vadd.f32 %v331_v8, %v228_v9  ;;  %v353_v11 = vpop.f32.mrb[1].mxu0 }
 0x197   :  { %359 = vmatmul.mubr.msk.f32.vlgmr.msra.gmra.mrb[0].mxu1 %vm241_vm7, %v229_v10 }
 0x26a   :  { %v311_v13 = vpop.f32.mrb[0].mxu1 }
 0x26b   :  { %v312_v14 = vadd.f32 %v333_v12, %v311_v13  ;;  %v360_v15 = vpop.f32.mrb[1].mxu1 }
 0x26d   :  { %315 = vst.msk [vmem:[#allocation6] sm:$0x3] %vm39_vm0, %v312_v14 }
 0x26e   :  { %410 = shalt.err (!%p407_p12)
}
 0x26f   :  { %s411_s24 = scalar_lea.hbm %s518_s5, 32 }
 0x270   :  { %p412_p13 = scmp.ne.s32.totalorder %s518_s5, %s411_s24  ;;  %p415_p0 = scmp.lt.u32.totalorder %s411_s24, %s518_s5 }
 0x272   :  { %p417_p1 = pnand %p415_p0, %p412_p13 }
 0x274   :  { %420 = shalt.err (!%p417_p1)
}
 0x275   :  { %325 = dma.vmem_to_hbm [thread:$0]  %s323_s22, 32, %s518_s5, [#allocation5]  }
 0x276   :  { %423 = dma.done.wait [#allocation5], 32  }
 0x277   :  { %424 = vsyncadd [#allocation5], 4294967264 }
 0x278   :  { %329 = vsyncpa [#allocation4], 1 }
 0x279   :  { %330 = vsyncpa [#allocation5], 1 }

</bundles_post_ra>
